<compile_context>
chip_gen: v7x
topology: tpu7x:2x2x1
jax: 0.10.0
libtpu: 0.0.40
codegen_flags: <defaults>
</compile_context>

<pallas_src>
import functools
import math

import jax
import jax.numpy as jnp
from jax.experimental import pallas as pl
from jax.experimental.pallas import tpu as pltpu


def _spatial_attn_kernel(key_size, value_size,
                         x_ref, f_ref, wx_ref, wf_ref, b_ref, o_ref):
    K, V = key_size, value_size
    Bb, T, Cin = x_ref.shape
    Fdim = f_ref.shape[-1]

    x = x_ref[...]                                   # (Bb, T, Cin) f32
    feat = f_ref[...]                                # (Bb, T, F)   f32

    rows = Bb * T
    x2 = x.reshape(rows, Cin).astype(jnp.bfloat16)
    f2 = feat.reshape(rows, Fdim).astype(jnp.bfloat16)

    # Fused [Q*scale | K | V] projection: one lane-dense slab, bf16 in / f32 acc.
    qkv = (jnp.dot(x2, wx_ref[...], preferred_element_type=jnp.float32)
           + jnp.dot(f2, wf_ref[...], preferred_element_type=jnp.float32)
           + b_ref[...])                             # (rows, 2K+V) f32

    q = qkv[:, :K].reshape(Bb, T, K)                 # already scaled by 1/sqrt(K)
    k = qkv[:, K:2 * K].reshape(Bb, T, K)
    v = qkv[:, 2 * K:].reshape(Bb, T, V)

    # scores[b, j, i] = <q_bj, k_bi>
    scores = jnp.einsum('bqk,btk->bqt',
                        q.astype(jnp.bfloat16), k.astype(jnp.bfloat16),
                        preferred_element_type=jnp.float32)  # (Bb, T, T)

    # Causal mask built in-kernel (torch: masked_fill where col > row -> -inf).
    row = jax.lax.broadcasted_iota(jnp.int32, (T, T), 0)
    col = jax.lax.broadcasted_iota(jnp.int32, (T, T), 1)
    scores = jnp.where((col > row)[None], jnp.float32(-jnp.inf), scores)

    # Softmax over the QUERY axis (torch dim=1 of (B, Tq, Tk)) — kept in f32.
    m = jnp.max(scores, axis=1, keepdims=True)
    e = jnp.exp(scores - m)
    s = jnp.sum(e, axis=1, keepdims=True)
    attn = e * pl.reciprocal(s, approx=True)

    out = jnp.einsum('bqt,btv->bqv',
                     attn.astype(jnp.bfloat16), v.astype(jnp.bfloat16),
                     preferred_element_type=jnp.float32)     # (Bb, T, V)

    # Fused torch.cat((input, temp), dim=2); the two slices cover the block.
    o_ref[:, :, :Cin] = x.astype(o_ref.dtype)
    o_ref[:, :, Cin:] = out.astype(o_ref.dtype)


def _fuse_params(params, key_size, in_channels):
    """Build fused [Q*1/sqrt(K) | K | V] weight slabs (bf16) and fused bias (f32)."""
    wq, bq, wk, bk, wv, bv = params
    Cin = in_channels
    K = wq.shape[1]
    V = wv.shape[1]
    Fdim = wq.shape[0] - Cin
    scale = 1.0 / math.sqrt(key_size)

    w_x = jnp.concatenate([wq[:Cin] * scale, wk, wv], axis=1)            # (Cin, 2K+V)
    w_f = jnp.concatenate(
        [wq[Cin:] * scale, jnp.zeros((Fdim, K + V), wq.dtype)], axis=1)  # (F, 2K+V)
    b = jnp.concatenate([bq * scale, bk, bv], axis=1)                    # (1, 2K+V)
    return w_x.astype(jnp.bfloat16), w_f.astype(jnp.bfloat16), b.astype(jnp.float32)


def _choose_block_b(B, T, target_rows=128):
    """Batches per grid step: fill ~target_rows sublane rows, divide B evenly,
    and keep >= 2 grid steps when possible (v7x has 2 TensorCores)."""
    cap = max(1, target_rows // max(T, 1))
    divisors = [d for d in range(1, B + 1) if B % d == 0]
    candidates = [d for d in divisors if d <= cap] or [1]
    bb = max(candidates)
    if B // bb < 2:
        two_step = [d for d in candidates if B // d >= 2]
        if two_step:
            bb = max(two_step)
    return bb


def spatial_attention_block(inp, feature, params, key_size, block_b=None):
    """inp: (B, T, Cin), feature: (B, T, F). Returns (B, T, Cin + value_size)."""
    B, T, Cin = inp.shape
    Fdim = feature.shape[-1]
    wq, bq, wk, bk, wv, bv = params
    K = wq.shape[1]
    V = wv.shape[1]
    assert K == key_size
    P = 2 * K + V

    wx, wf, bfused = _fuse_params(params, key_size, Cin)

    if block_b is None:
        block_b = _choose_block_b(B, T)
    assert B % block_b == 0
    grid = (B // block_b,)

    kernel = functools.partial(_spatial_attn_kernel, K, V)

    return pl.pallas_call(
        kernel,
        out_shape=jax.ShapeDtypeStruct((B, T, Cin + V), jnp.float32),
        grid_spec=pltpu.PrefetchScalarGridSpec(
            num_scalar_prefetch=0,
            grid=grid,
            in_specs=[
                pl.BlockSpec((block_b, T, Cin), lambda b: (b, 0, 0)),
                pl.BlockSpec((block_b, T, Fdim), lambda b: (b, 0, 0)),
                pl.BlockSpec((Cin, P), lambda b: (0, 0)),
                pl.BlockSpec((Fdim, P), lambda b: (0, 0)),
                pl.BlockSpec((1, P), lambda b: (0, 0)),
            ],
            out_specs=pl.BlockSpec((block_b, T, Cin + V), lambda b: (b, 0, 0)),
        ),
        compiler_params=pltpu.CompilerParams(
            dimension_semantics=("parallel",)),
    )(inp, feature, wx, wf, bfused)


def init_params(key, in_channels, feature_dim, key_size, value_size):
    """Deterministic init mimicking nn.Linear's uniform(-1/sqrt(fan_in), ...).
    Weights stored transposed: (in_features, out_features)."""
    ks = jax.random.split(key, 6)

    def lin(kw, kb, fan_in, fan_out):
        bound = 1.0 / math.sqrt(fan_in)
        w = jax.random.uniform(kw, (fan_in, fan_out), jnp.float32, -bound, bound)
        b = jax.random.uniform(kb, (1, fan_out), jnp.float32, -bound, bound)
        return w, b

    wq, bq = lin(ks[0], ks[1], in_channels + feature_dim, key_size)
    wk, bk = lin(ks[2], ks[3], in_channels, key_size)
    wv, bv = lin(ks[4], ks[5], in_channels, value_size)
    return (wq, bq, wk, bk, wv, bv)


def _reference(inp, feature, params, key_size):
    """Pure-JAX f32 reference replicating the torch forward exactly."""
    wq, bq, wk, bk, wv, bv = params
    T = inp.shape[1]
    keys = inp @ wk + bk
    query = jnp.concatenate([inp, feature], axis=2) @ wq + bq
    values = inp @ wv + bv
    temp = jnp.einsum('bqk,btk->bqt', query, keys)
    mask = (jnp.arange(T)[None, :] > jnp.arange(T)[:, None])  # col > row
    temp = jnp.where(mask[None], -jnp.inf, temp)
    temp = jax.nn.softmax(temp / math.sqrt(key_size), axis=1)  # torch dim=1
    temp = jnp.einsum('bqt,btv->bqv', temp, values)
    return jnp.concatenate([inp, temp], axis=2)


if __name__ == "__main__":
    B, T = 2, 8
    in_channels, feature_dim = 4, 4
    key_size, value_size = 16, 8

    root = jax.random.PRNGKey(0)
    k_x, k_f, k_p = jax.random.split(root, 3)

    x = jax.random.normal(k_x, (B, T, in_channels), jnp.float32)
    feat = jax.random.normal(k_f, (B, T, feature_dim), jnp.float32)
    params = init_params(k_p, in_channels, feature_dim, key_size, value_size)

    out = spatial_attention_block(x, feat, params, key_size)
    out = jax.block_until_ready(out)

    ref = _reference(x, feat, params, key_size)
    assert out.shape == (B, T, in_channels + value_size), out.shape
    # bf16 MXU operands + approx reciprocal -> tolerance relaxed vs f32 reference.
    assert jnp.allclose(out, ref, atol=5e-2, rtol=5e-2), float(
        jnp.max(jnp.abs(out - ref)))

    print("KERNEL_OK")
</pallas_src>

<mosaic_0001>
module attributes {stable_mosaic.version = 11 : i64} {
  func.func @_spatial_attn_kernel(%arg0: i32, %arg1: memref<1x8x4xf32, #tpu.memory_space<vmem>>, %arg2: memref<1x8x4xf32, #tpu.memory_space<vmem>>, %arg3: memref<4x40xbf16, #tpu.memory_space<vmem>>, %arg4: memref<4x40xbf16, #tpu.memory_space<vmem>>, %arg5: memref<1x40xf32, #tpu.memory_space<vmem>>, %arg6: memref<1x8x12xf32, #tpu.memory_space<vmem>>) attributes {dimension_semantics = [#tpu.dimension_semantics<parallel>], iteration_bounds = array<i64: 2>, scalar_prefetch = 0 : i64, scratch_operands = 0 : i64, tpu.core_type = #tpu.core_type<tc>, window_params = [{transform_indices = @transform_0, window_bounds = array<i64: 1, 8, 4>}, {transform_indices = @transform_1, window_bounds = array<i64: 1, 8, 4>}, {pipeline_mode = #tpu.pipeline_mode<synchronous>, transform_indices = @transform_2, window_bounds = array<i64: 4, 40>}, {pipeline_mode = #tpu.pipeline_mode<synchronous>, transform_indices = @transform_3, window_bounds = array<i64: 4, 40>}, {pipeline_mode = #tpu.pipeline_mode<synchronous>, transform_indices = @transform_4, window_bounds = array<i64: 1, 40>}, {transform_indices = @transform_5, window_bounds = array<i64: 1, 8, 12>}]} {
    %c0 = arith.constant 0 : index
    %c0_0 = arith.constant 0 : index
    %c0_1 = arith.constant 0 : index
    %0 = vector.load %arg1[%c0, %c0_0, %c0_1] : memref<1x8x4xf32, #tpu.memory_space<vmem>>, vector<1x8x4xf32>
    %c0_2 = arith.constant 0 : index
    %c0_3 = arith.constant 0 : index
    %c0_4 = arith.constant 0 : index
    %1 = vector.load %arg2[%c0_2, %c0_3, %c0_4] : memref<1x8x4xf32, #tpu.memory_space<vmem>>, vector<1x8x4xf32>
    %2 = vector.shape_cast %0 : vector<1x8x4xf32> to vector<8x4xf32>
    %3 = arith.truncf %2 : vector<8x4xf32> to vector<8x4xbf16>
    %4 = vector.shape_cast %1 : vector<1x8x4xf32> to vector<8x4xf32>
    %5 = arith.truncf %4 : vector<8x4xf32> to vector<8x4xbf16>
    %c0_5 = arith.constant 0 : index
    %c0_6 = arith.constant 0 : index
    %6 = vector.load %arg3[%c0_5, %c0_6] : memref<4x40xbf16, #tpu.memory_space<vmem>>, vector<4x40xbf16>
    %cst = arith.constant dense<0.000000e+00> : vector<8x40xf32>
    %7 = tpu.matmul %3, %6, %cst {dimension_numbers = #tpu.dot_dimension_numbers<[1], [0], [0], [1], [0, 0, 1, 1], [], []>} : vector<8x4xbf16>, vector<4x40xbf16>, vector<8x40xf32> -> vector<8x40xf32>
    %c0_7 = arith.constant 0 : index
    %c0_8 = arith.constant 0 : index
    %8 = vector.load %arg4[%c0_7, %c0_8] : memref<4x40xbf16, #tpu.memory_space<vmem>>, vector<4x40xbf16>
    %cst_9 = arith.constant dense<0.000000e+00> : vector<8x40xf32>
    %9 = tpu.matmul %5, %8, %cst_9 {dimension_numbers = #tpu.dot_dimension_numbers<[1], [0], [0], [1], [0, 0, 1, 1], [], []>} : vector<8x4xbf16>, vector<4x40xbf16>, vector<8x40xf32> -> vector<8x40xf32>
    %10 = arith.addf %7, %9 : vector<8x40xf32>
    %c0_10 = arith.constant 0 : index
    %c0_11 = arith.constant 0 : index
    %11 = vector.load %arg5[%c0_10, %c0_11] : memref<1x40xf32, #tpu.memory_space<vmem>>, vector<1x40xf32>
    %12 = vector.broadcast %11 : vector<1x40xf32> to vector<8x40xf32>
    %13 = arith.addf %10, %12 : vector<8x40xf32>
    %14 = vector.extract_strided_slice %13 {offsets = [0, 0], sizes = [8, 16], strides = [1, 1]} : vector<8x40xf32> to vector<8x16xf32>
    %15 = vector.shape_cast %14 : vector<8x16xf32> to vector<1x8x16xf32>
    %16 = vector.extract_strided_slice %13 {offsets = [0, 16], sizes = [8, 16], strides = [1, 1]} : vector<8x40xf32> to vector<8x16xf32>
    %17 = vector.shape_cast %16 : vector<8x16xf32> to vector<1x8x16xf32>
    %18 = vector.extract_strided_slice %13 {offsets = [0, 32], sizes = [8, 8], strides = [1, 1]} : vector<8x40xf32> to vector<8x8xf32>
    %19 = vector.shape_cast %18 : vector<8x8xf32> to vector<1x8x8xf32>
    %20 = arith.truncf %15 : vector<1x8x16xf32> to vector<1x8x16xbf16>
    %21 = arith.truncf %17 : vector<1x8x16xf32> to vector<1x8x16xbf16>
    "tpu.trace_start"() <{level = 10 : i32, message = "bqk,btk->bqt"}> : () -> ()
    %cst_12 = arith.constant dense<0.000000e+00> : vector<1x8x8xf32>
    %22 = tpu.matmul %20, %21, %cst_12 {dimension_numbers = #tpu.dot_dimension_numbers<[2], [2], [1], [1], [0, 0, 0, 1, 1, 1], [0], [0]>} : vector<1x8x16xbf16>, vector<1x8x16xbf16>, vector<1x8x8xf32> -> vector<1x8x8xf32>
    "tpu.trace_stop"() : () -> ()
    %23 = tpu.iota {dimensions = array<i32: 0>} : vector<8x8xi32>
    %24 = tpu.iota {dimensions = array<i32: 1>} : vector<8x8xi32>
    %25 = arith.cmpi sgt, %24, %23 : vector<8x8xi32>
    %26 = vector.shape_cast %25 : vector<8x8xi1> to vector<1x8x8xi1>
    %cst_13 = arith.constant 0xFF800000 : f32
    %27 = vector.broadcast %cst_13 : f32 to vector<1x8x8xf32>
    %28 = arith.select %26, %27, %22 : vector<1x8x8xi1>, vector<1x8x8xf32>
    %cst_14 = arith.constant dense<0xFF800000> : vector<1x8xf32>
    %29 = vector.multi_reduction <maximumf>, %28, %cst_14 [1] : vector<1x8x8xf32> to vector<1x8xf32>
    %30 = vector.shape_cast %29 : vector<1x8xf32> to vector<1x1x8xf32>
    %31 = vector.broadcast %30 : vector<1x1x8xf32> to vector<1x8x8xf32>
    %32 = arith.subf %28, %31 : vector<1x8x8xf32>
    %33 = math.exp %32 : vector<1x8x8xf32>
    %cst_15 = arith.constant dense<0.000000e+00> : vector<1x8xf32>
    %34 = vector.multi_reduction <add>, %33, %cst_15 [1] : vector<1x8x8xf32> to vector<1x8xf32>
    %35 = vector.shape_cast %34 : vector<1x8xf32> to vector<1x1x8xf32>
    %36 = tpu.reciprocal %35 {approx = true} : vector<1x1x8xf32> -> vector<1x1x8xf32>
    %37 = vector.broadcast %36 : vector<1x1x8xf32> to vector<1x8x8xf32>
    %38 = arith.mulf %33, %37 : vector<1x8x8xf32>
    %39 = arith.truncf %38 : vector<1x8x8xf32> to vector<1x8x8xbf16>
    %40 = arith.truncf %19 : vector<1x8x8xf32> to vector<1x8x8xbf16>
    "tpu.trace_start"() <{level = 10 : i32, message = "bqt,btv->bqv"}> : () -> ()
    %cst_16 = arith.constant dense<0.000000e+00> : vector<1x8x8xf32>
    %41 = tpu.matmul %39, %40, %cst_16 {dimension_numbers = #tpu.dot_dimension_numbers<[2], [1], [1], [2], [0, 0, 0, 1, 1, 2], [0], [0]>} : vector<1x8x8xbf16>, vector<1x8x8xbf16>, vector<1x8x8xf32> -> vector<1x8x8xf32>
    "tpu.trace_stop"() : () -> ()
    %c0_17 = arith.constant 0 : index
    %c0_18 = arith.constant 0 : index
    %c0_19 = arith.constant 0 : index
    %42 = vector.load %arg6[%c0_17, %c0_18, %c0_19] : memref<1x8x12xf32, #tpu.memory_space<vmem>>, vector<1x8x4xf32>
    tpu.vector_store %arg6[%c0_17, %c0_18, %c0_19], %0 {strides = array<i32>} : memref<1x8x12xf32, #tpu.memory_space<vmem>>, vector<1x8x4xf32>,
    %c0_20 = arith.constant 0 : index
    %c0_21 = arith.constant 0 : index
    %c4 = arith.constant 4 : index
    %43 = vector.load %arg6[%c0_20, %c0_21, %c4] : memref<1x8x12xf32, #tpu.memory_space<vmem>>, vector<1x8x8xf32>
    tpu.vector_store %arg6[%c0_20, %c0_21, %c4], %41 {strides = array<i32>} : memref<1x8x12xf32, #tpu.memory_space<vmem>>, vector<1x8x8xf32>,
    return
  }
  func.func @transform_0(%arg0: i32) -> (i32, i32, i32) {
    %c0_i32 = arith.constant 0 : i32
    %c0_i32_0 = arith.constant 0 : i32
    %c0_i32_1 = arith.constant 0 : i32
    return %arg0, %c0_i32, %c0_i32_0 : i32, i32, i32
  }
  func.func @transform_1(%arg0: i32) -> (i32, i32, i32) {
    %c0_i32 = arith.constant 0 : i32
    %c0_i32_0 = arith.constant 0 : i32
    %c0_i32_1 = arith.constant 0 : i32
    return %arg0, %c0_i32, %c0_i32_0 : i32, i32, i32
  }
  func.func @transform_2(%arg0: i32) -> (i32, i32) {
    %c0_i32 = arith.constant 0 : i32
    %c0_i32_0 = arith.constant 0 : i32
    %c0_i32_1 = arith.constant 0 : i32
    return %c0_i32, %c0_i32_0 : i32, i32
  }
  func.func @transform_3(%arg0: i32) -> (i32, i32) {
    %c0_i32 = arith.constant 0 : i32
    %c0_i32_0 = arith.constant 0 : i32
    %c0_i32_1 = arith.constant 0 : i32
    return %c0_i32, %c0_i32_0 : i32, i32
  }
  func.func @transform_4(%arg0: i32) -> (i32, i32) {
    %c0_i32 = arith.constant 0 : i32
    %c0_i32_0 = arith.constant 0 : i32
    %c0_i32_1 = arith.constant 0 : i32
    return %c0_i32, %c0_i32_0 : i32, i32
  }
  func.func @transform_5(%arg0: i32) -> (i32, i32, i32) {
    %c0_i32 = arith.constant 0 : i32
    %c0_i32_0 = arith.constant 0 : i32
    %c0_i32_1 = arith.constant 0 : i32
    return %arg0, %c0_i32, %c0_i32_0 : i32, i32, i32
  }
}

</mosaic_0001>

<bundles_post_ra>
// kernel: tpu_custom_call.1
= control target key start
LH: loop header
LB: loop body
LE: loop exit
PB: predicated region body
PF: predicated region fallthrough
CT: control target
= control target key end

     0   :  { %10 = vsyncpa [#allocation3], 0  ;;  %s888_s0 = inlined_call_operand.vmem [shape: f32[2,8,4], index: 0, kind: input, shape index: {}]   ;;  %s889_s1 = inlined_call_operand.vmem [shape: f32[2,8,4], index: 1, kind: input, shape index: {}]   ;;  %s890_s2 = inlined_call_operand.vmem [shape: bf16[4,40], index: 2, kind: input, shape index: {}]   ;;  %s891_s3 = inlined_call_operand.vmem [shape: bf16[4,40], index: 3, kind: input, shape index: {}]   ;;  %s892_s4 = inlined_call_operand.vmem [shape: f32[1,40], index: 4, kind: input, shape index: {}]   ;;  %s893_s5 = inlined_call_operand.hbm [shape: f32[2,8,12], index: 5, kind: output, shape index: {}]  }
   0x1   :  { %12 = vsyncpa [#allocation3 + $0x1], 0  ;;  %s761_s18 = smov 0   ;;  %s763_s19 = smov 0  }
   0x2   :  { %s765_s20 = smov 0   ;;  %s767_s21 = smov 0  }
   0x3 LB: > { %s782_s22 = sadd.s32 4294967295, %s723_s21   ;;  %s565_s23 = sadd.s32 4294967294, %s723_s21   ;;  %s723_s21 = sphi %s767_s21, %s899_s21   ;;  %s719_s20 = sphi %s765_s20, %s898_s20   ;;  %s715_s19 = sphi %s763_s19, %s897_s19   ;;  %s711_s18 = sphi %s761_s18, %s896_s18  }
   0x4   : > { %s786_s24 = sadd.s32 1, %s723_s21   ;;  %s140_s25 = sadd.s32 1, %s719_s20 }
   0x5   : > { %s137_s26 = ssub.s32 %s723_s21, %s786_s24  ;;  %p150_p0 = scmp.ne.s32.totalorder %s719_s20, %s715_s19 }
   0x6   : > { %p138_p1 = scmp.eq.s32.totalorder %s137_s26, 0  ;;  %p151_p2 = scmp.eq.s32.totalorder %s782_s22, 1 }
   0x7   : > { %p156_p3 = scmp.ne.s32.totalorder %s715_s19, %s711_s18  ;;  %p157_p4 = scmp.eq.s32.totalorder %s565_s23, 1 }
   0x8   : > { %s797_s27 = scalar_select %p138_p1, %s719_s20, %s140_s25  }
   0x9   : > { %p799_p5 = por %p151_p2, %p150_p0  ;;  %p803_p6 = por %p157_p4, %p156_p3 }
   0xa   : > { %p568_p7 = scmp.ge.s32.totalorder %s723_s21, 1  ;;  %p198_p8 = scmp.lt.s32.totalorder %s723_s21, 3 }
   0xc   : > { %p199_p9 = pnand %p568_p7, %p198_p8 }
   0xd   : > { %v243_v0 = vld [vmem:[%s891_s3] sm:$0x3] (!%p199_p9)  ;;  %vm248_vm0 = vcmask (!%p199_p9), 1041408   ;;  %v725_v2 = vmov (!%p199_p9), 0.0   ;;  %p229_p10 = scmp.lt.s32.totalorder (!%p199_p9), %s782_s22, 1  ;;  %vm726_vm1 = vmmov (!%p199_p9), 0   ;;  %v397_v25 = vlaneseq (!%p199_p9) }
   0xe   : > { %202 = sbr.rel (%p199_p9) target bundleno = 980 (0x3d4), region = 40  ;;  %v242_v1 = vld [vmem:[%s890_s2] sm:$0x3] (!%p199_p9)  ;;  %589 = vmatprep.subr.bf16.mxu0 (!%p199_p9), %v725_v2  ;;  %595 = vmatprep.subr.bf16.mxu1 (!%p199_p9), %v725_v2  ;;  %v250_v3 = vsel (!%p199_p9), %vm248_vm0, %v243_v0, 0  ;;  %vm244_vm2 = vcmask (!%p199_p9), 31744   ;;  %s727_s25 = smov (!%p199_p9), 112  }
   0xf   : > { %v296_v4 = vsel (!%p199_p9), %vm248_vm0, %v242_v1, 0  ;;  %590 = vmatpush3.bf16.msra.mxu0 (!%p199_p9), %v250_v3  ;;  %591 = vmatprep.mubr.msk.bf16.mxu0 (!%p199_p9), %vm726_vm1, %v725_v2  ;;  %v574_v11 = vld [vmem:[%s892_s4] ss:$0 sm:$0xff] (!%p199_p9)  ;;  %s728_s26 = smov (!%p199_p9), 96   ;;  %vm350_vm3 = vcmask (!%p199_p9), 130048   ;;  %vm429_vm4 = vcmask (!%p199_p9), 1043456  }
  0x10   : > { %596 = vmatpush3.bf16.msra.mxu1 (!%p199_p9), %v296_v4  ;;  %597 = vmatprep.mubr.msk.bf16.mxu1 (!%p199_p9), %vm726_vm1, %v725_v2  ;;  %v398_v26 = vshrl.u32 (!%p199_p9), %v397_v25, 7  ;;  %v400_v27 = vand.u32 (!%p199_p9), 127, %v397_v25  ;;  %vm403_vm6 = vcmask (!%p199_p9), 64512   ;;  %s226_s30 = sand.u32 (!%p199_p9), 1, %s715_s19   ;;  %s729_s8 = smov (!%p199_p9), 4   ;;  %vm478_vm7 = vcmask (!%p199_p9), 97312  }
  0x11   : > { %601 = vmatprep.subr.bf16.mxu0 (!%p199_p9), %v725_v2  ;;  %607 = vmatprep.subr.bf16.mxu1 (!%p199_p9), %v725_v2  ;;  %s569_s6 = sshll.u32 (!%p199_p9), %s226_s30, 3  ;;  %s481_s14 = scalar_lea.sflag (!%p199_p9), [#allocation3], %s226_s30 }
  0x12   : > { %vm401_vm5 = vcmp.gt.s32.totalorder (!%p199_p9), %v400_v27, %v398_v26  ;;  %s228_s7 = scalar_lea.vmem (!%p199_p9), [#allocation2], %s569_s6 }
  0x15   : > { %s230_s9 = scalar_select %p229_p10, %s782_s22, 1 }
  0x17   : > { %s570_s10 = sshll.u32 %s230_s9, 3  ;;  %s578_s9 = sshll.u32 %s782_s22, 7 }
  0x18   : > { %s236_s13 = scalar_lea.vmem %s889_s1, %s570_s10  ;;  %s232_s16 = scalar_lea.vmem %s888_s0, %s570_s10 }
  0x19   : > { %v239_v5 = vld [vmem:[%s236_s13] sm:$0xff]  ;;  %s494_s10 = sshll.u32 %s228_s7, 4  ;;  %s846_s13 = scalar_lea.hbm %s893_s5, %s578_s9  ;;  %s848_s10 = int_to_ptr.vmem [resolvable:$true] %s494_s10 }
  0x1a   : > { %v825_v6 = vld [vmem:[%s232_s16] sm:$0xff]  ;;  %v241_v7 = vpack.c.bf16 %v239_v5, %v239_v5  ;;  %s661_s15 = scalar_lea.vmem %s848_s10, 128  ;;  %s730_s22 = smov [#allocation2]  }
  0x1b   : > { %v240_v8 = vpack.c.bf16 %v825_v6, %v825_v6  ;;  %473 = vst.msk [vmem:[%s228_s7] sm:$0xff] %vm244_vm2, %v825_v6  ;;  %p662_p11 = scmp.ne.s32.totalorder %s848_s10, %s661_s15  ;;  %s665_s16 = sshll.u32 %s730_s22, 4  ;;  %s666_s16 = int_to_ptr.vmem [resolvable:$false] %s665_s16 }
  0x1c   : > { %592 = vmatmul.mubr.msk.bf16.vlgmr.msra.gmra.mrb[0].mxu0 %vm244_vm2, %v241_v7  ;;  %s667_s17 = scalar_lea.vmem %s666_s16, 256  ;;  %p668_p0 = scmp.lt.s32.totalorder %s848_s10, %s666_s16 }
  0x1d   : > { %598 = vmatmul.mubr.msk.bf16.vlgmr.msra.gmra.mrb[0].mxu1 %vm244_vm2, %v240_v8  ;;  %603 = vmatprep.mubr.msk.bf16.mxu0 %vm726_vm1, %v725_v2  ;;  %p663_p12 = pnand %p662_p11, %p799_p5  ;;  %p669_p1 = scmp.lt.s32.totalorder %s667_s17, %s661_s15 }
  0x1e   : > { %609 = vmatprep.mubr.msk.bf16.mxu1 %vm726_vm1, %v725_v2 }
  0x1f   : > { %p664_p13 = pneg %p663_p12  ;;  %p670_p2 = por %p669_p1, %p668_p0 }
  0x21   : > { %p671_p3 = pnand %p670_p2, %p664_p13 }
  0xef   : > { %v286_v9 = vpop.f32.mrb[0].mxu0 }
  0xf0   : > { %v332_v10 = vpop.f32.mrb[0].mxu1  ;;  %v593_v13 = vpop.f32.mrb[1].mxu0 }
  0xf1   : > { %v333_v12 = vadd.f32 %v332_v10, %v286_v9  ;;  %v599_v14 = vpop.f32.mrb[1].mxu1  ;;  %v289_v15 = vpop.f32.mrb[2].mxu0 }
  0xf2   : > { %v335_v16 = vpop.f32.mrb[2].mxu1  ;;  %v594_v18 = vpop.f32.mrb[3].mxu0 }
  0xf3   : > { %v345_v17 = vadd.f32 %v574_v11, %v333_v12  ;;  %v600_v19 = vpop.f32.mrb[3].mxu1 }
  0xf5   : > { %v346_v20 = vpack.c.bf16 %v345_v17, %v345_v17 }
  0xf7   : > { %348 = vrot.lane.b32.xlu0 %v346_v20, %s727_s25 }
  0xfb   : > { %424 = vrot.lane.b32.xlu0 %v346_v20, %s728_s26 }
 0x169   : > { %v349_v21 = vpop.permute.xlu0 %348 }
 0x16a   : > { %v355_v22 = vsel %vm350_vm3, %v349_v21, 0 }
 0x16b   : > { %602 = vmatpush3.bf16.xpose.msra.mxu0 %v355_v22 }
 0x16d   : > { %v425_v23 = vpop.permute.xlu0 %424 }
 0x16e   : > { %v431_v24 = vsel %vm429_vm4, %v425_v23, 0 }
 0x16f   : > { %608 = vmatpush3.bf16.msra.mxu1 %v431_v24 }
 0x172   : > { %604 = vmatmul.mubr.msk.bf16.vlgmr.msra.gmra.mrb[4].mxu0 %vm350_vm3, %v346_v20 }
 0x245   : > { %v391_v28 = vpop.f32.mrb[4].mxu0 }
 0x246   : > { %v402_v29 = vsel %vm401_vm5, -inf, %v391_v28  ;;  %v605_v30 = vpop.f32.mrb[5].mxu0 }
 0x247   : > { %v404_v31 = vsel %vm403_vm6, %v402_v29, -inf  ;;  %v394_v32 = vpop.f32.mrb[6].mxu0 }
 0x248   : > { %v405_v33 = vrot.slane %v404_v31, 4  ;;  %v606_v34 = vpop.f32.mrb[7].mxu0 }
 0x24a   : > { %v406_v35 = vmax.f32 %v404_v31, %v405_v33 }
 0x24c   : > { %v407_v36 = vrot.slane %v406_v35, 2 }
 0x24e   : > { %v408_v37 = vmax.f32 %v406_v35, %v407_v36 }
 0x250   : > { %v409_v38 = vrot.slane %v408_v37, 1 }
 0x252   : > { %v410_v39 = vmax.f32 %v408_v37, %v409_v38 }
 0x254   : > { %v411_v40 = vsub.f32 %v402_v29, %v410_v39 }
 0x256   : > { %v412_v41 = vmul.f32 1.442695, %v411_v40 }
 0x258   : > { %657 = vpow2.f32 %v412_v41 }
 0x262   : > { %v658_v42 = vpop.eup %657 }
 0x263   : > { %v414_v43 = vsel %vm403_vm6, %v658_v42, 0.0 }
 0x264   : > { %v415_v44 = vrot.slane %v414_v43, 4 }
 0x266   : > { %v416_v45 = vadd.f32 %v415_v44, %v414_v43 }
 0x268   : > { %v417_v46 = vrot.slane %v416_v45, 2 }
 0x26a   : > { %v418_v47 = vadd.f32 %v417_v46, %v416_v45 }
 0x26c   : > { %v419_v48 = vrot.slane %v418_v47, 1 }
 0x26e   : > { %v420_v49 = vadd.f32 %v419_v48, %v418_v47 }
 0x270   : > { %659 = vrcp.f32 %v420_v49 }
 0x27a   : > { %v660_v50 = vpop.eup %659 }
 0x27b   : > { %v422_v51 = vmul.f32 %v660_v50, %v658_v42 }
 0x27d   : > { %v423_v52 = vpack.c.bf16 %v422_v51, %v422_v51 }
 0x27f   : > { %610 = vmatmul.mubr.msk.bf16.vlgmr.msra.gmra.mrb[4].mxu1 %vm403_vm6, %v423_v52 }
 0x352   : > { %v467_v53 = vpop.f32.mrb[4].mxu1 }
 0x353   : > { %475 = vrot.lane.b32.xlu1 %v467_v53, %s729_s8  ;;  %v611_v54 = vpop.f32.mrb[5].mxu1 }
 0x354   : > { %v470_v55 = vpop.f32.mrb[6].mxu1 }
 0x355   : > { %v612_v56 = vpop.f32.mrb[7].mxu1 }
 0x3c5   : > { %v476_v57 = vpop.permute.xlu1 %475 }
 0x3c6   : > { %479 = vst.msk [vmem:[%s228_s7] sm:$0xff] %vm478_vm7, %v476_v57 }
 0x3c7   : > { %674 = shalt.err (!%p671_p3)
}
 0x3c8   : > { %s675_s23 = scalar_lea.hbm %s846_s13, 128  ;;  %s679_s30 = scalar_lea.hbm %s893_s5, 256 }
 0x3c9   : > { %p676_p4 = scmp.ne.s32.totalorder %s846_s13, %s675_s23  ;;  %p680_p9 = scmp.lt.u32.totalorder %s846_s13, %s893_s5 }
 0x3ca   : > { %p681_p10 = scmp.lt.u32.totalorder %s679_s30, %s675_s23  ;;  %p683_p12 = scmp.lt.u32.totalorder %s675_s23, %s846_s13 }
 0x3cb   : > { %p677_p7 = pnand %p676_p4, %p799_p5 }
 0x3cc   : > { %p682_p11 = por %p681_p10, %p680_p9 }
 0x3cd   : > { %p678_p8 = pneg %p677_p7 }
 0x3ce   : > { %p684_p13 = por %p683_p12, %p682_p11 }
 0x3d0   : > { %p685_p0 = pnand %p684_p13, %p678_p8 }
 0x3d2   : > { %688 = shalt.err (!%p685_p0)
}
 0x3d3   : > { %613 = dma.vmem_to_hbm [thread:$0]  (%p799_p5), %s848_s10, 128, %s846_s13, %s481_s14  }
 0x3d4 PF: > { %p619_p1 = scmp.ge.s32.totalorder %s723_s21, 2  ;;  %s506_s8 = sand.u32 1, %s711_s18  }
 0x3d5   : > { %s507_s9 = scalar_lea.sflag [#allocation3], %s506_s8 }
 0x3d6   : > { %p616_p2 = pnand %p619_p1, %p803_p6 }
 0x3d8   : > { %706 = dma.done.wait (!%p616_p2), %s507_s9, 128  }
 0x3d9   : > { %708 = vsyncadd (!%p616_p2), %s507_s9, 4294967168  ;;  %p15_p3 = scmp.ge.s32.totalorder %s786_s24, 4   ;;  %s896_s18 = smov %s715_s19 }
 0x3da   : > { %s897_s19 = smov %s719_s20  ;;  %s898_s20 = smov %s797_s27 }
 0x3db   : > { %s899_s21 = smov %s786_s24  ;;  %17 = sbr.rel (!%p15_p3) target bundleno = 3 (0x3), region = 78 }
 0x3e2   :  { %512 = vsyncpa [#allocation3], 1 }
 0x3e3   :  { %514 = vsyncpa [#allocation3 + $0x1], 1 }

</bundles_post_ra>
